<compile_context>
chip_gen: v5e
topology: v5e:2x2
jax: 0.10.0
libtpu: 0.0.40
codegen_flags: <defaults>
</compile_context>

<pallas_src>
import functools

import jax
import jax.numpy as jnp
from jax.experimental import pallas as pl
from jax.experimental.pallas import tpu as pltpu


def se_block_kernel(x_ref, w1_ref, b1_ref, w2_ref, b2_ref, o_ref, *, inv_hw):
    # x_ref : (NB, C, HW)  native io dtype (f32 or bf16)
    # w1_ref: (mid, C) f32,  b1_ref: (1, mid) f32
    # w2_ref: (C, mid) f32,  b2_ref: (1, C)  f32
    x = x_ref[...]

    # Global average pool — accumulate in f32 without materializing a
    # full-block f32 upcast of x.
    pooled = jnp.sum(x, axis=-1, dtype=jnp.float32) * inv_hw        # (NB, C)

    # FC1 + ReLU — mid = C // 16 is far too small for the MXU; keep it on the
    # VPU/XLU in f32 (free filler under the DMA bottleneck).
    w1 = w1_ref[...]                                                # (mid, C)
    b1 = b1_ref[...]                                                # (1, mid)
    h = jnp.sum(pooled[:, None, :] * w1[None, :, :], axis=-1) + b1  # (NB, mid)
    h = jnp.maximum(h, 0.0)

    # FC2 + sigmoid (EUP handles the exp).
    w2 = w2_ref[...]                                                # (C, mid)
    b2 = b2_ref[...]                                                # (1, C)
    g = jnp.sum(h[:, None, :] * w2[None, :, :], axis=-1) + b2       # (NB, C)
    g = jax.nn.sigmoid(g)

    # Scale x in its streamed dtype: downcast the tiny gate, not the big x.
    o_ref[...] = x * g.astype(o_ref.dtype)[:, :, None]


def _is_multi_tc_chip():
    # Best-effort detection of v7x-class parts (2 TensorCores per chip).
    try:
        kind = jax.devices()[0].device_kind.lower().replace(" ", "")
        return ("v7" in kind) or ("tpu7" in kind)
    except Exception:  # pragma: no cover - detection is advisory only
        return False


def se_block(x_nchw, w1, b1, w2, b2, *,
             block_bytes_target=6 * 1024 * 1024,
             core_parallel=None):
    """SEBlock forward.

    x_nchw: (N, C, H, W) in f32 or bf16 — streamed and returned in that same
      dtype (no wrapper-side conversions; pass bf16 activations if the
      surrounding graph already carries bf16).
    w1: (mid, C); b1: (mid,); w2: (C, mid); b2: (C,)  — the 1x1-conv params.
    """
    N, C, H, W = x_nchw.shape
    HW = H * W
    mid = w1.shape[0]
    io_dtype = x_nchw.dtype
    itemsize = jnp.dtype(io_dtype).itemsize

    # Free contiguous view; no pad, no dtype conversion, no tail slice later.
    x = x_nchw.reshape(N, C, HW)

    # Images per grid step: purely bytes-driven, independent of divisibility.
    per_image_bytes = C * HW * itemsize
    nb = int(max(1, min(N, block_bytes_target // per_image_bytes)))
    grid = (pl.cdiv(N, nb),)

    # Weights/biases stay f32 (tiny; gate precision matters, bandwidth doesn't).
    w1_c = w1.astype(jnp.float32)
    b1_c = b1.reshape(1, mid).astype(jnp.float32)
    w2_c = w2.astype(jnp.float32)
    b2_c = b2.reshape(1, C).astype(jnp.float32)

    kernel = functools.partial(se_block_kernel, inv_hw=1.0 / float(HW))

    if core_parallel is None:
        core_parallel = _is_multi_tc_chip()
    # v7x: shard the batch axis across both TensorCores (mem-bound => ~2x).
    batch_sem = pltpu.CORE_PARALLEL if core_parallel else "parallel"

    # Advisory scheduling hint: this call is long and HBM-bandwidth bound.
    cost = pl.CostEstimate(
        flops=int(2 * N * C * HW + 4 * N * mid * C),
        transcendentals=int(N * C),
        bytes_accessed=int(2 * N * C * HW * itemsize),
    )

    out = pl.pallas_call(
        kernel,
        out_shape=jax.ShapeDtypeStruct((N, C, HW), io_dtype),
        grid_spec=pltpu.PrefetchScalarGridSpec(
            num_scalar_prefetch=0,
            grid=grid,
            in_specs=[
                # Last dim is the full HW => exempt from the 128-multiple rule
                # (masked tail vst when HW % 128 != 0 — cheaper than an extra
                # full-tensor pad/slice pass in HBM).
                pl.BlockSpec((nb, C, HW), lambda n: (n, 0, 0)),
                pl.BlockSpec((mid, C), lambda n: (0, 0)),
                pl.BlockSpec((1, mid), lambda n: (0, 0)),
                pl.BlockSpec((C, mid), lambda n: (0, 0)),
                pl.BlockSpec((1, C), lambda n: (0, 0)),
            ],
            out_specs=pl.BlockSpec((nb, C, HW), lambda n: (n, 0, 0)),
        ),
        compiler_params=pltpu.CompilerParams(
            dimension_semantics=(batch_sem,),
            # 2x(in + out) blocks at <=6 MiB each plus tiny weights stays well
            # under this on every generation, including 64 MiB-VMEM v7x parts.
            vmem_limit_bytes=48 * 1024 * 1024,
        ),
        cost_estimate=cost,
    )(x, w1_c, b1_c, w2_c, b2_c)

    return out.reshape(N, C, H, W)


def se_block_ref(x, w1, b1, w2, b2):
    """Pure-JAX reference mirroring the PyTorch forward (f32)."""
    xf = x.astype(jnp.float32)
    pooled = jnp.mean(xf, axis=(2, 3))                       # (N, C)
    h = jnp.maximum(pooled @ w1.T + b1, 0.0)                 # (N, mid)
    g = jax.nn.sigmoid(h @ w2.T + b2)                        # (N, C)
    return xf * g[:, :, None, None]


if __name__ == "__main__":
    # SEBlock(channels=32, reduction=16) -> mid_channels = 2
    C, reduction = 32, 16
    mid = C // reduction

    key = jax.random.PRNGKey(0)
    k1, k2, k3, k4, kx1, kx2 = jax.random.split(key, 6)

    # conv1x1 weights (kernel_size=1) flattened to FC shapes.
    w1 = jax.random.normal(k1, (mid, C), dtype=jnp.float32) * 0.1
    b1 = jax.random.normal(k2, (mid,), dtype=jnp.float32) * 0.1
    w2 = jax.random.normal(k3, (C, mid), dtype=jnp.float32) * 0.1
    b2 = jax.random.normal(k4, (C,), dtype=jnp.float32) * 0.1

    # Case 1: f32, HW a multiple of 128, whole batch in one block.
    x1 = jax.random.normal(kx1, (2, C, 16, 16), dtype=jnp.float32)
    out1 = jax.block_until_ready(se_block(x1, w1, b1, w2, b2))
    ref1 = se_block_ref(x1, w1, b1, w2, b2)
    assert out1.shape == x1.shape and out1.dtype == x1.dtype
    assert jnp.allclose(out1, ref1, atol=1e-5, rtol=1e-5), "f32 mismatch"

    # Case 2: HW=144 (not a multiple of 128 -> full-dim block, masked tail
    # stores, no padding pass) and N=3 with nb forced to 2 -> exercises the
    # partial trailing batch block (masked writeback of the padded rows).
    x2 = jax.random.normal(kx2, (3, C, 12, 12), dtype=jnp.float32)
    per_img = C * 144 * 4
    out2 = jax.block_until_ready(
        se_block(x2, w1, b1, w2, b2, block_bytes_target=2 * per_img))
    ref2 = se_block_ref(x2, w1, b1, w2, b2)
    assert out2.shape == x2.shape
    assert jnp.allclose(out2, ref2, atol=1e-5, rtol=1e-5), "partial-block mismatch"

    # Case 3: bf16 activations streamed as-is (no wrapper dtype conversion);
    # gate math stays f32 inside the kernel.  Gate is computed from bf16
    # activations, hence the loose tolerance vs. the f32 reference.
    x3 = x1.astype(jnp.bfloat16)
    out3 = jax.block_until_ready(se_block(x3, w1, b1, w2, b2))
    assert out3.shape == x1.shape and out3.dtype == jnp.bfloat16
    assert jnp.allclose(out3.astype(jnp.float32), ref1,
                        atol=5e-2, rtol=5e-2), "bf16 mismatch"

    print("KERNEL_OK")
</pallas_src>

<mosaic_0001>
module attributes {stable_mosaic.version = 11 : i64} {
  func.func @se_block_kernel(%arg0: i32, %arg1: memref<2x32x256xf32, #tpu.memory_space<vmem>>, %arg2: memref<2x32xf32, #tpu.memory_space<vmem>>, %arg3: memref<1x2xf32, #tpu.memory_space<vmem>>, %arg4: memref<32x2xf32, #tpu.memory_space<vmem>>, %arg5: memref<1x32xf32, #tpu.memory_space<vmem>>, %arg6: memref<2x32x256xf32, #tpu.memory_space<vmem>>) attributes {dimension_semantics = [#tpu.dimension_semantics<parallel>], iteration_bounds = array<i64: 1>, scalar_prefetch = 0 : i64, scratch_operands = 0 : i64, tpu.core_type = #tpu.core_type<tc>, window_params = [{transform_indices = @transform_0, window_bounds = array<i64: 2, 32, 256>}, {pipeline_mode = #tpu.pipeline_mode<synchronous>, transform_indices = @transform_1, window_bounds = array<i64: 2, 32>}, {pipeline_mode = #tpu.pipeline_mode<synchronous>, transform_indices = @transform_2, window_bounds = array<i64: 1, 2>}, {pipeline_mode = #tpu.pipeline_mode<synchronous>, transform_indices = @transform_3, window_bounds = array<i64: 32, 2>}, {pipeline_mode = #tpu.pipeline_mode<synchronous>, transform_indices = @transform_4, window_bounds = array<i64: 1, 32>}, {transform_indices = @transform_5, window_bounds = array<i64: 2, 32, 256>}]} {
    %c0 = arith.constant 0 : index
    %c0_0 = arith.constant 0 : index
    %c0_1 = arith.constant 0 : index
    %0 = vector.load %arg1[%c0, %c0_0, %c0_1] : memref<2x32x256xf32, #tpu.memory_space<vmem>>, vector<2x32x256xf32>
    %cst = arith.constant dense<0.000000e+00> : vector<2x32xf32>
    %1 = vector.multi_reduction <add>, %0, %cst [2] : vector<2x32x256xf32> to vector<2x32xf32>
    %cst_2 = arith.constant 3.906250e-03 : f32
    %2 = vector.broadcast %cst_2 : f32 to vector<2x32xf32>
    %3 = arith.mulf %1, %2 : vector<2x32xf32>
    %c0_3 = arith.constant 0 : index
    %c0_4 = arith.constant 0 : index
    %4 = vector.load %arg2[%c0_3, %c0_4] : memref<2x32xf32, #tpu.memory_space<vmem>>, vector<2x32xf32>
    %c0_5 = arith.constant 0 : index
    %c0_6 = arith.constant 0 : index
    %5 = vector.load %arg3[%c0_5, %c0_6] : memref<1x2xf32, #tpu.memory_space<vmem>>, vector<1x2xf32>
    %6 = vector.shape_cast %3 : vector<2x32xf32> to vector<2x1x32xf32>
    %7 = vector.shape_cast %4 : vector<2x32xf32> to vector<1x2x32xf32>
    %8 = vector.broadcast %6 : vector<2x1x32xf32> to vector<2x2x32xf32>
    %9 = vector.broadcast %7 : vector<1x2x32xf32> to vector<2x2x32xf32>
    %10 = arith.mulf %8, %9 : vector<2x2x32xf32>
    %cst_7 = arith.constant dense<0.000000e+00> : vector<2x2xf32>
    %11 = vector.multi_reduction <add>, %10, %cst_7 [2] : vector<2x2x32xf32> to vector<2x2xf32>
    %12 = vector.broadcast %5 : vector<1x2xf32> to vector<2x2xf32>
    %13 = arith.addf %11, %12 : vector<2x2xf32>
    %cst_8 = arith.constant 0.000000e+00 : f32
    %14 = vector.broadcast %cst_8 : f32 to vector<2x2xf32>
    %15 = arith.maximumf %13, %14 : vector<2x2xf32>
    %c0_9 = arith.constant 0 : index
    %c0_10 = arith.constant 0 : index
    %16 = vector.load %arg4[%c0_9, %c0_10] : memref<32x2xf32, #tpu.memory_space<vmem>>, vector<32x2xf32>
    %c0_11 = arith.constant 0 : index
    %c0_12 = arith.constant 0 : index
    %17 = vector.load %arg5[%c0_11, %c0_12] : memref<1x32xf32, #tpu.memory_space<vmem>>, vector<1x32xf32>
    %18 = vector.shape_cast %15 : vector<2x2xf32> to vector<2x1x2xf32>
    %19 = vector.shape_cast %16 : vector<32x2xf32> to vector<1x32x2xf32>
    %20 = vector.broadcast %18 : vector<2x1x2xf32> to vector<2x32x2xf32>
    %21 = vector.broadcast %19 : vector<1x32x2xf32> to vector<2x32x2xf32>
    %22 = arith.mulf %20, %21 : vector<2x32x2xf32>
    %cst_13 = arith.constant dense<0.000000e+00> : vector<2x32xf32>
    %23 = vector.multi_reduction <add>, %22, %cst_13 [2] : vector<2x32x2xf32> to vector<2x32xf32>
    %24 = vector.broadcast %17 : vector<1x32xf32> to vector<2x32xf32>
    %25 = arith.addf %23, %24 : vector<2x32xf32>
    %26 = arith.negf %25 : vector<2x32xf32>
    %27 = math.exp %26 : vector<2x32xf32>
    %cst_14 = arith.constant 1.000000e+00 : f32
    %28 = vector.broadcast %cst_14 : f32 to vector<2x32xf32>
    %29 = arith.addf %28, %27 : vector<2x32xf32>
    %30 = arith.divf %28, %29 : vector<2x32xf32>
    %31 = vector.shape_cast %30 : vector<2x32xf32> to vector<2x32x1xf32>
    %32 = vector.broadcast %31 : vector<2x32x1xf32> to vector<2x32x256xf32>
    %33 = arith.mulf %0, %32 : vector<2x32x256xf32>
    %c0_15 = arith.constant 0 : index
    %c0_16 = arith.constant 0 : index
    %c0_17 = arith.constant 0 : index
    %34 = vector.load %arg6[%c0_15, %c0_16, %c0_17] : memref<2x32x256xf32, #tpu.memory_space<vmem>>, vector<2x32x256xf32>
    tpu.vector_store %arg6[%c0_15, %c0_16, %c0_17], %33 {strides = array<i32>} : memref<2x32x256xf32, #tpu.memory_space<vmem>>, vector<2x32x256xf32>,
    return
  }
  func.func @transform_0(%arg0: i32) -> (i32, i32, i32) {
    %c0_i32 = arith.constant 0 : i32
    %c0_i32_0 = arith.constant 0 : i32
    %c0_i32_1 = arith.constant 0 : i32
    return %arg0, %c0_i32, %c0_i32_0 : i32, i32, i32
  }
  func.func @transform_1(%arg0: i32) -> (i32, i32) {
    %c0_i32 = arith.constant 0 : i32
    %c0_i32_0 = arith.constant 0 : i32
    %c0_i32_1 = arith.constant 0 : i32
    return %c0_i32, %c0_i32_0 : i32, i32
  }
  func.func @transform_2(%arg0: i32) -> (i32, i32) {
    %c0_i32 = arith.constant 0 : i32
    %c0_i32_0 = arith.constant 0 : i32
    %c0_i32_1 = arith.constant 0 : i32
    return %c0_i32, %c0_i32_0 : i32, i32
  }
  func.func @transform_3(%arg0: i32) -> (i32, i32) {
    %c0_i32 = arith.constant 0 : i32
    %c0_i32_0 = arith.constant 0 : i32
    %c0_i32_1 = arith.constant 0 : i32
    return %c0_i32, %c0_i32_0 : i32, i32
  }
  func.func @transform_4(%arg0: i32) -> (i32, i32) {
    %c0_i32 = arith.constant 0 : i32
    %c0_i32_0 = arith.constant 0 : i32
    %c0_i32_1 = arith.constant 0 : i32
    return %c0_i32, %c0_i32_0 : i32, i32
  }
  func.func @transform_5(%arg0: i32) -> (i32, i32, i32) {
    %c0_i32 = arith.constant 0 : i32
    %c0_i32_0 = arith.constant 0 : i32
    %c0_i32_1 = arith.constant 0 : i32
    return %arg0, %c0_i32, %c0_i32_0 : i32, i32, i32
  }
}

</mosaic_0001>

<bundles_post_ra>
// kernel: tpu_custom_call.1
= control target key start
LH: loop header
LB: loop body
LE: loop exit
PB: predicated region body
PF: predicated region fallthrough
CT: control target
= control target key end

     0   :  { %10 = vsyncpa [#allocation3], 0  ;;  %s2011_s0 = inlined_call_operand.hbm [shape: f32[2,32,256], index: 0, kind: input, shape index: {}]   ;;  %s2012_s1 = inlined_call_operand.vmem [shape: f32[2,32], index: 1, kind: input, shape index: {}]   ;;  %s2013_s2 = inlined_call_operand.vmem [shape: f32[1,2], index: 2, kind: input, shape index: {}]   ;;  %s2014_s3 = inlined_call_operand.vmem [shape: f32[32,2], index: 3, kind: input, shape index: {}]   ;;  %s2015_s4 = inlined_call_operand.vmem [shape: f32[1,32], index: 4, kind: input, shape index: {}]   ;;  %s2016_s5 = inlined_call_operand.hbm [shape: f32[2,32,256], index: 5, kind: output, shape index: {}]  }
   0x1   :  { %11 = vsyncpa [#allocation4], 0  ;;  %s16_s20 = sshll.u32 %s2011_s0, 4  ;;  %s1451_s21 = smov [#allocation2]   ;;  %s17_s20 = int_to_ptr.hbm [resolvable:$true] %s16_s20 }
   0x2   :  { %s18_s22 = sshll.u32 %s1451_s21, 4  ;;  %s1452_s23 = smov 256   ;;  %s19_s22 = int_to_ptr.vmem [resolvable:$true] %s18_s22 }
   0x3   :  { %s1453_s24 = smov 16  }
   0x4   :  { %24 = dma.hbm_to_vmem [thread:$0]  %s17_s20, 2048, %s19_s22, [#allocation3], %s1452_s23, %s1452_s23, %s1453_s24  }
   0x5   :  { %1447 = dma.done.wait [#allocation3], 2048  }
   0x6   :  { %1448 = vsyncadd [#allocation3], 4294965248  ;;  %v89_v0 = vlaneseq  ;;  %v45_v3 = vld [vmem:[#allocation2 + $0x40] sm:$0xff]  ;;  %v46_v4 = vld [vmem:[#allocation2 + $0x48] sm:$0xff]  ;;  %v1454_v45 = vmov 0   ;;  %vm231_vm0 = vcmask 130112  }
   0x7   :  { %v41_v5 = vld [vmem:[#allocation2 + $0x20] sm:$0xff]  ;;  %v65_v6 = vadd.f32 %v46_v4, %v45_v3  ;;  %v42_v7 = vld [vmem:[#allocation2 + $0x28] sm:$0xff]  ;;  %v47_v12 = vld [vmem:[#allocation2 + $0x50] sm:$0xff]  ;;  %vm235_vm1 = vcmask 195712   ;;  %vm239_vm2 = vcmask 261312   ;;  %vm262_vm3 = vcmask 1041409  }
   0x8   :  { %v1493_v1 = vshrl.u32 %v89_v0, 7  ;;  %v37_v8 = vld [vmem:[#allocation2] sm:$0xff]  ;;  %v38_v9 = vld [vmem:[#allocation2 + $0x8] sm:$0xff]  ;;  %v59_v10 = vadd.f32 %v42_v7, %v41_v5  ;;  %v48_v14 = vld [vmem:[#allocation2 + $0x58] sm:$0xff]  ;;  %vm267_vm4 = vcmask 254976   ;;  %vm937_vm5 = vcmask 1042434  }
   0x9   :  { %v53_v11 = vadd.f32 %v38_v9, %v37_v8  ;;  %66 = vadd.xlane.f32.xlu2 %v65_v6  ;;  %v43_v15 = vld [vmem:[#allocation2 + $0x30] sm:$0xff]  ;;  %v44_v16 = vld [vmem:[#allocation2 + $0x38] sm:$0xff]  ;;  %v68_v19 = vadd.f32 %v48_v14, %v47_v12  ;;  %v49_v24 = vld [vmem:[#allocation2 + $0x60] sm:$0xff]  ;;  %vm939_vm6 = vcmask 1043459   ;;  %vm941_vm7 = vcmask 1044484   ;;  %s1299_s13 = sshll.u32 %s2016_s5, 4  ;;  %s1300_s13 = int_to_ptr.hbm [resolvable:$true] %s1299_s13 }
   0xa   :  { %1325 = vset.pattern.permute.xlu2 %v1493_v1  ;;  %v1497_v2 = vadd.s32 8, %v1493_v1  ;;  %v1501_v13 = vadd.s32 16, %v1493_v1  ;;  %60 = vadd.xlane.f32.xlu1 %v59_v10  ;;  %v39_v17 = vld [vmem:[#allocation2 + $0x10] sm:$0xff]  ;;  %v40_v18 = vld [vmem:[#allocation2 + $0x18] sm:$0xff]  ;;  %v62_v20 = vadd.f32 %v44_v16, %v43_v15  ;;  %v50_v25 = vld [vmem:[#allocation2 + $0x68] sm:$0xff]  ;;  %v1508_v30 = vadd.s32 24, %v1493_v1 }
   0xb   :  { %54 = vadd.xlane.f32.xlu0 %v53_v11  ;;  %v56_v21 = vadd.f32 %v40_v18, %v39_v17  ;;  %v51_v22 = vld [vmem:[#allocation2 + $0x70] sm:$0xff]  ;;  %v52_v23 = vld [vmem:[#allocation2 + $0x78] sm:$0xff]  ;;  %v71_v27 = vadd.f32 %v50_v25, %v49_v24  ;;  %v85_v28 = vld [vmem:[%s2012_s1] sm:$0x3]  ;;  %vm943_vm8 = vcmask 1045509   ;;  %vm945_vm9 = vcmask 1046534  }
   0xc   :  { %1326 = vset.pattern.permute.xlu0 %v1497_v2  ;;  %1327 = vset.pattern.permute.xlu1 %v1501_v13  ;;  %v74_v26 = vadd.f32 %v52_v23, %v51_v22  ;;  %v88_v29 = vperm.slane %v85_v28, 0  ;;  %v1515_v31 = vld [vmem:[%s2014_s3] sm:$0xff]  ;;  %v113_v33 = vperm.slane %v85_v28, 1  ;;  %v1522_v34 = vld [vmem:[%s2014_s3 + $0x8] sm:$0xff]  ;;  %v1529_v36 = vld [vmem:[%s2014_s3 + $0x10] sm:$0xff]  ;;  %vm947_vm10 = vcmask 1047559  }
   0xd   :  { %v338_v32 = vperm.slane %v1515_v31, 6  ;;  %v401_v35 = vperm.slane %v1522_v34, 7  ;;  %v422_v37 = vperm.slane %v1529_v36, 2  ;;  %v443_v38 = vperm.slane %v1529_v36, 5  ;;  %v1538_v39 = vld [vmem:[%s2014_s3 + $0x18] sm:$0xff] }
   0xe   :  { %v464_v40 = vperm.slane %v1538_v39, 0  ;;  %v485_v41 = vperm.slane %v1538_v39, 3  ;;  %v1349_v42 = vld [vmem:[%s2013_s2] ss:$0 sm:$0xff]  ;;  %v506_v43 = vperm.slane %v1538_v39, 6  ;;  %v296_v44 = vperm.slane %v1515_v31, 0 }
   0xf   :  { %v303_v46 = vperm.slane %v1515_v31, 1  ;;  %v310_v28 = vperm.slane %v1515_v31, 2  ;;  %vm1006_vm11 = vcmask 15360  }
  0x11   :  { %69 = vadd.xlane.f32.xlu2 %v68_v19 }
  0x12   :  { %63 = vadd.xlane.f32.xlu1 %v62_v20 }
  0x13   :  { %57 = vadd.xlane.f32.xlu0 %v56_v21 }
  0x1a   :  { %75 = vadd.xlane.f32.xlu1 %v74_v26 }
  0x1b   :  { %72 = vadd.xlane.f32.xlu0 %v71_v27 }
  0x29   :  { %93 = vperm.xlu2 %1325, %v88_v29  }
  0x2f   :  { %99 = vperm.xlu0 %1326, %v88_v29  }
  0x31   :  { %1328 = vset.pattern.permute.xlu2 %v1508_v30 }
  0x33   :  { %105 = vperm.xlu1 %1327, %v88_v29  }
  0x37   :  { %1338 = vset.pattern.permute.xlu0 %v1493_v1 }
  0x39   :  { %111 = vperm.xlu2 %1328, %v88_v29   ;;  %v324_v29 = vperm.slane %v1515_v31, 4 }
  0x3b   :  { %1330 = vset.pattern.permute.xlu1 %v1497_v2 }
  0x3f   :  { %343 = vperm.xlu0 %1338, %v338_v32  }
  0x41   :  { %1329 = vset.pattern.permute.xlu2 %v1493_v1 }
  0x43   :  { %124 = vperm.xlu1 %1330, %v113_v33  }
  0x47   :  { %406 = vperm.xlu0 %1338, %v401_v35   ;;  %v359_v35 = vperm.slane %v1522_v34, 1 }
  0x49   :  { %118 = vperm.xlu2 %1329, %v113_v33  }
  0x4b   :  { %1332 = vset.pattern.permute.xlu1 %v1508_v30 }
  0x4f   :  { %427 = vperm.xlu0 %1338, %v422_v37  }
  0x51   :  { %1331 = vset.pattern.permute.xlu2 %v1501_v13 }
  0x53   :  { %136 = vperm.xlu1 %1332, %v113_v33  }
  0x57   :  { %448 = vperm.xlu0 %1338, %v443_v38   ;;  %v331_v38 = vperm.slane %v1515_v31, 5 }
  0x59   :  { %130 = vperm.xlu2 %1331, %v113_v33   ;;  %v317_v33 = vperm.slane %v1515_v31, 3 }
  0x5b   :  { %1334 = vset.pattern.permute.xlu1 %v1454_v45 }
  0x5f   :  { %469 = vperm.xlu0 %1338, %v464_v40   ;;  %v373_v40 = vperm.slane %v1522_v34, 3 }
  0x61   :  { %1333 = vset.pattern.permute.xlu2 %v1493_v1 }
  0x67   :  { %490 = vperm.xlu0 %1338, %v485_v41   ;;  %v345_v41 = vperm.slane %v1515_v31, 7  ;;  %v429_v31 = vperm.slane %v1529_v36, 3 }
  0x69   :  { %280 = vperm.xlu2 %1333, %v1349_v42  }
  0x6f   :  { %511 = vperm.xlu0 %1338, %v506_v43  }
  0x71   :  { %301 = vperm.xlu2 %1333, %v296_v44   ;;  %v387_v44 = vperm.slane %v1522_v34, 5 }
  0x77   :  { %1339 = vset.pattern.permute.xlu0 %v1454_v45 }
  0x79   :  { %308 = vperm.xlu2 %1333, %v303_v46   ;;  %v352_v46 = vperm.slane %v1522_v34, 0 }
  0x7c   :  { %v67_v47 = vpop.xlane.xlu2 %66 }
  0x7d   :  { %v61_v52 = vpop.xlane.xlu1 %60  ;;  %v81_v59 = vmul.f32 0.00390625, %v67_v47 }
  0x7e   :  { %v55_v49 = vpop.xlane.xlu0 %54  ;;  %v79_v5 = vmul.f32 0.00390625, %v61_v52 }
  0x7f   :  { %v77_v50 = vmul.f32 0.00390625, %v55_v49 }
  0x81   :  { %1335 = vset.pattern.permute.xlu2 %v1454_v45 }
  0x84   :  { %v70_v48 = vpop.xlane.xlu2 %69 }
  0x85   :  { %v64_v55 = vpop.xlane.xlu1 %63  ;;  %v82_v16 = vmul.f32 0.00390625, %v70_v48  ;;  %v408_v48 = vperm.slane %v1529_v36, 0 }
  0x86   :  { %v58_v54 = vpop.xlane.xlu0 %57  ;;  %v80_v8 = vmul.f32 0.00390625, %v64_v55 }
  0x87   :  { %v78_v63 = vmul.f32 0.00390625, %v58_v54  ;;  %v380_v54 = vperm.slane %v1522_v34, 4 }
  0x8c   :  { %v94_v51 = vpop.permute.xlu2 %93 }
  0x8d   :  { %v146_v53 = vmul.f32 %v94_v51, %v77_v50  ;;  %v76_v58 = vpop.xlane.xlu1 %75  ;;  %v154_v15 = vmul.f32 %v94_v51, %v81_v59 }
  0x8e   :  { %v73_v57 = vpop.xlane.xlu0 %72  ;;  %v84_v17 = vmul.f32 0.00390625, %v76_v58  ;;  %v471_v58 = vperm.slane %v1538_v39, 1 }
  0x8f   :  { %179 = vperm.xlu0 %1339, %v146_v53   ;;  %v83_v22 = vmul.f32 0.00390625, %v73_v57  ;;  %v450_v53 = vperm.slane %v1529_v36, 6  ;;  %v394_v57 = vperm.slane %v1522_v34, 6 }
  0x94   :  { %v112_v56 = vpop.permute.xlu2 %111 }
  0x95   :  { %v149_v9 = vmul.f32 %v112_v56, %v80_v8  ;;  %v157_v20 = vmul.f32 %v112_v56, %v84_v17 }
  0xa1   :  { %v100_v3 = vpop.permute.xlu0 %99 }
  0xa2   :  { %v147_v6 = vmul.f32 %v100_v3, %v78_v63  ;;  %v155_v18 = vmul.f32 %v100_v3, %v82_v16 }
  0xa3   :  { %v119_v60 = vpop.permute.xlu2 %118 }
  0xa4   :  { %v150_v61 = vmul.f32 %v119_v60, %v77_v50  ;;  %v158_v62 = vmul.f32 %v119_v60, %v81_v59  ;;  %v366_v50 = vperm.slane %v1522_v34, 2  ;;  %v513_v34 = vperm.slane %v1538_v39, 7 }
  0xa5   :  { %v106_v4 = vpop.permute.xlu1 %105 }
  0xa6   :  { %215 = vperm.xlu2 %1335, %v158_v62   ;;  %191 = vperm.xlu1 %1334, %v150_v61   ;;  %v148_v7 = vmul.f32 %v106_v4, %v79_v5  ;;  %v156_v25 = vmul.f32 %v106_v4, %v83_v22  ;;  %v492_v61 = vperm.slane %v1538_v39, 4  ;;  %v415_v62 = vperm.slane %v1529_v36, 1 }
  0xae   :  { %185 = vperm.xlu1 %1334, %v148_v7   ;;  %182 = vperm.xlu2 %1335, %v147_v6   ;;  %v457_v7 = vperm.slane %v1529_v36, 7 }
  0xb1   :  { %v1553_v27 = vpop.permute.xlu0 %343 }
  0xb3   :  { %v131_v12 = vpop.permute.xlu2 %130 }
  0xb4   :  { %v152_v14 = vmul.f32 %v131_v12, %v79_v5  ;;  %v160_v23 = vmul.f32 %v131_v12, %v83_v22  ;;  %v436_v5 = vperm.slane %v1529_v36, 4 }
  0xb5   :  { %v125_v10 = vpop.permute.xlu1 %124 }
  0xb6   :  { %v151_v11 = vmul.f32 %v125_v10, %v78_v63  ;;  %188 = vperm.xlu2 %1335, %v149_v9   ;;  %v159_v26 = vmul.f32 %v125_v10, %v82_v16  ;;  %v499_v16 = vperm.slane %v1538_v39, 5 }
  0xb8   :  { %194 = vperm.xlu0 %1339, %v151_v11   ;;  %v478_v11 = vperm.slane %v1538_v39, 2 }
  0xb9   :  { %v1558_v32 = vpop.permute.xlu0 %406 }
  0xbe   :  { %197 = vperm.xlu2 %1335, %v152_v14  }
  0xc0   :  { %203 = vperm.xlu0 %1339, %v154_v15  }
  0xc1   :  { %v1562_v37 = vpop.permute.xlu0 %427 }
  0xc3   :  { %v1567_v42 = vpop.permute.xlu2 %280 }
  0xc5   :  { %v137_v19 = vpop.permute.xlu1 %136 }
  0xc6   :  { %v153_v21 = vmul.f32 %v137_v19, %v80_v8  ;;  %206 = vperm.xlu2 %1335, %v155_v18   ;;  %v161_v24 = vmul.f32 %v137_v19, %v84_v17  ;;  %v1605_v17 = vand.u32 127, %v89_v0 }
  0xc8   :  { %200 = vperm.xlu1 %1334, %v153_v21   ;;  %212 = vperm.xlu0 %1339, %v157_v20   ;;  %v233_v18 = vadd.s32 4294967280, %v1605_v17  ;;  %v229_v36 = vadd.s32 4294967288, %v1605_v17 }
  0xc9   :  { %v1569_v43 = vpop.permute.xlu0 %448 }
  0xcb   :  { %v1573_v47 = vpop.permute.xlu2 %301 }
  0xce   :  { %224 = vperm.xlu2 %1335, %v161_v24   ;;  %v237_v24 = vadd.s32 4294967272, %v1605_v17 }
  0xd0   :  { %221 = vperm.xlu0 %1339, %v160_v23   ;;  %209 = vperm.xlu1 %1334, %v156_v25  }
  0xd1   :  { %v1576_v49 = vpop.permute.xlu0 %469 }
  0xd3   :  { %v1580_v51 = vpop.permute.xlu2 %308 }
  0xd6   :  { %1336 = vset.pattern.permute.xlu2 %v1493_v1 }
  0xd8   :  { %218 = vperm.xlu1 %1334, %v159_v26  }
  0xd9   :  { %v1582_v52 = vpop.permute.xlu0 %490 }
  0xde   :  { %315 = vperm.xlu2 %1336, %v310_v28  }
  0xe0   :  { %1337 = vset.pattern.permute.xlu1 %v1493_v1 }
  0xe1   :  { %v1586_v56 = vpop.permute.xlu0 %511 }
  0xe6   :  { %322 = vperm.xlu2 %1336, %v317_v33  }
  0xe8   :  { %329 = vperm.xlu1 %1337, %v324_v29  }
  0xee   :  { %336 = vperm.xlu2 %1336, %v331_v38  }
  0xf0   :  { %364 = vperm.xlu1 %1337, %v359_v35  }
  0xf6   :  { %350 = vperm.xlu2 %1336, %v345_v41  }
  0xf8   :  { %378 = vperm.xlu1 %1337, %v373_v40  }
  0xfe   :  { %357 = vperm.xlu2 %1336, %v352_v46  }
 0x100   :  { %392 = vperm.xlu1 %1337, %v387_v44   ;;  %v216_v55 = vpop.permute.xlu2 %215 }
 0x101   :  { %v1592_v60 = vpop.permute.xlu0 %179  ;;  %v255_v23 = vperm.slane %v216_v55, %v1605_v17 }
 0x102   :  { %v228_v33 = vperm.slane %v1592_v60, %v1605_v17 }
 0x106   :  { %371 = vperm.xlu2 %1336, %v366_v50  }
 0x108   :  { %413 = vperm.xlu1 %1337, %v408_v48   ;;  %v1590_v59 = vpop.permute.xlu2 %182 }
 0x109   :  { %v230_v40 = vperm.slane %v1590_v59, %v229_v36 }
 0x10b   :  { %v232_v59 = vsel %vm231_vm0, %v230_v40, %v228_v33 }
 0x10e   :  { %385 = vperm.xlu2 %1336, %v380_v54  }
 0x110   :  { %434 = vperm.xlu1 %1337, %v429_v31   ;;  %v1596_v4 = vpop.permute.xlu2 %188 }
 0x116   :  { %399 = vperm.xlu2 %1336, %v394_v57  }
 0x118   :  { %455 = vperm.xlu1 %1337, %v450_v53   ;;  %v192_v63 = vpop.permute.xlu1 %191  ;;  %v198_v9 = vpop.permute.xlu2 %197 }
 0x119   :  { %v241_v0 = vperm.slane %v192_v63, %v1605_v17  ;;  %v244_v57 = vperm.slane %v198_v9, %v233_v18  ;;  %v238_v63 = vperm.slane %v1596_v4, %v237_v24 }
 0x11e   :  { %420 = vperm.xlu2 %1336, %v415_v62  }
 0x120   :  { %476 = vperm.xlu1 %1337, %v471_v58   ;;  %v186_v6 = vpop.permute.xlu1 %185  ;;  %v207_v14 = vpop.permute.xlu2 %206 }
 0x121   :  { %v249_v21 = vperm.slane %v207_v14, %v229_v36  ;;  %v234_v48 = vperm.slane %v186_v6, %v233_v18 }
 0x126   :  { %441 = vperm.xlu2 %1336, %v436_v5  }
 0x128   :  { %497 = vperm.xlu1 %1337, %v492_v61   ;;  %v225_v39 = vpop.permute.xlu2 %224  ;;  %v236_v61 = vsel %vm235_vm1, %v234_v48, %v232_v59 }
 0x129   :  { %v260_v41 = vperm.slane %v225_v39, %v237_v24 }
 0x12a   :  { %v195_v3 = vpop.permute.xlu0 %194 }
 0x12b   :  { %v242_v26 = vperm.slane %v195_v3, %v229_v36 }
 0x12d   :  { %v243_v50 = vsel %vm231_vm0, %v242_v26, %v241_v0 }
 0x12e   :  { %462 = vperm.xlu2 %1336, %v457_v7   ;;  %v245_v62 = vsel %vm235_vm1, %v244_v57, %v243_v50 }
 0x130   :  { %518 = vperm.xlu1 %1337, %v513_v34   ;;  %v240_v34 = vsel %vm239_vm2, %v238_v63, %v236_v61 }
 0x132   :  { %v204_v8 = vpop.permute.xlu0 %203 }
 0x133   :  { %v248_v19 = vperm.slane %v204_v8, %v1605_v17 }
 0x135   :  { %v250_v28 = vsel %vm231_vm0, %v249_v21, %v248_v19 }
 0x136   :  { %483 = vperm.xlu2 %1336, %v478_v11  }
 0x138   :  { %1341 = vset.pattern.permute.xlu1 %v1454_v45  ;;  %v1632_v7 = vpop.permute.xlu2 %315 }
 0x13a   :  { %v201_v10 = vpop.permute.xlu1 %200  ;;  %v213_v12 = vpop.permute.xlu0 %212 }
 0x13b   :  { %v253_v44 = vperm.slane %v213_v12, %v237_v24  ;;  %v246_v53 = vperm.slane %v201_v10, %v237_v24 }
 0x13d   :  { %v247_v3 = vsel %vm239_vm2, %v246_v53, %v245_v62 }
 0x13e   :  { %504 = vperm.xlu2 %1336, %v499_v16   ;;  %v263_v5 = vsel %vm262_vm3, %v247_v3, %v240_v34 }
 0x13f   :  { %v268_v6 = vsel %vm267_vm4, %v263_v5, 0.0 }
 0x140   :  { %v1634_v8 = vpop.permute.xlu2 %322 }
 0x142   :  { %v210_v15 = vpop.permute.xlu1 %209  ;;  %v222_v22 = vpop.permute.xlu0 %221 }
 0x143   :  { %v251_v20 = vperm.slane %v210_v15, %v233_v18  ;;  %v258_v38 = vperm.slane %v222_v22, %v233_v18 }
 0x145   :  { %v252_v35 = vsel %vm235_vm1, %v251_v20, %v250_v28 }
 0x146   :  { %v254_v54 = vsel %vm239_vm2, %v253_v44, %v252_v35  ;;  %1340 = vset.pattern.permute.xlu2 %v1454_v45 }
 0x148   :  { %v1638_v10 = vpop.permute.xlu2 %336 }
 0x14a   :  { %v219_v25 = vpop.permute.xlu1 %218 }
 0x14b   :  { %v256_v29 = vperm.slane %v219_v25, %v229_v36 }
 0x14d   :  { %v257_v46 = vsel %vm231_vm0, %v256_v29, %v255_v23 }
 0x14e   :  { %v259_v31 = vsel %vm235_vm1, %v258_v38, %v257_v46 }
 0x14f   :  { %v261_v55 = vsel %vm239_vm2, %v260_v41, %v259_v31 }
 0x150   :  { %v264_v58 = vsel %vm262_vm3, %v261_v55, %v254_v54  ;;  %v1642_v12 = vpop.permute.xlu2 %350 }
 0x151   :  { %v271_v60 = vsel %vm267_vm4, %v264_v58, 0.0 }
 0x152   :  { %272 = vadd.xlane.f32.xlu0 %v271_v60 }
 0x158   :  { %v1646_v14 = vpop.permute.xlu2 %357 }
 0x15a   :  { %269 = vadd.xlane.f32.xlu1 %v268_v6  ;;  %v1636_v9 = vpop.permute.xlu1 %329 }
 0x160   :  { %v1650_v16 = vpop.permute.xlu2 %371 }
 0x162   :  { %v1640_v11 = vpop.permute.xlu1 %364 }
 0x168   :  { %v1654_v36 = vpop.permute.xlu2 %385 }
 0x16a   :  { %v1644_v4 = vpop.permute.xlu1 %378 }
 0x170   :  { %v1658_v20 = vpop.permute.xlu2 %399 }
 0x172   :  { %v1648_v15 = vpop.permute.xlu1 %392 }
 0x178   :  { %v1662_v22 = vpop.permute.xlu2 %420 }
 0x17a   :  { %v1652_v18 = vpop.permute.xlu1 %413 }
 0x180   :  { %v1666_v24 = vpop.permute.xlu2 %441 }
 0x182   :  { %v1656_v19 = vpop.permute.xlu1 %434 }
 0x188   :  { %v1668_v25 = vpop.permute.xlu2 %462 }
 0x18a   :  { %v1660_v21 = vpop.permute.xlu1 %455 }
 0x190   :  { %v1673_v33 = vpop.permute.xlu2 %483 }
 0x192   :  { %v1664_v23 = vpop.permute.xlu1 %476 }
 0x19a   :  { %v498_v39 = vpop.permute.xlu1 %497 }
 0x1a2   :  { %v519_v26 = vpop.permute.xlu1 %518 }
 0x1c5   :  { %v273_v0 = vpop.xlane.xlu0 %272 }
 0x1c6   :  { %v284_v28 = vadd.f32 %v1567_v42, %v273_v0 }
 0x1c8   :  { %v1671_v29 = vmax.f32 %v284_v28, 0.0 }
 0x1ca   :  { %v1677_v38 = vmul.f32 %v1673_v33, %v1671_v29  ;;  %v1680_v40 = vmul.f32 %v498_v39, %v1671_v29  ;;  %v1683_v41 = vmul.f32 %v519_v26, %v1671_v29 }
 0x1cd   :  { %v270_v35 = vpop.xlane.xlu1 %269 }
 0x1ce   :  { %v283_v44 = vadd.f32 %v1567_v42, %v270_v35 }
 0x1d0   :  { %v1686_v46 = vmax.f32 %v283_v44, 0.0 }
 0x1d2   :  { %v552_v48 = vmul.f32 %v1573_v47, %v1686_v46  ;;  %v553_v31 = vmul.f32 %v1580_v51, %v1686_v46  ;;  %v554_v50 = vmul.f32 %v1632_v7, %v1686_v46  ;;  %v580_v53 = vmul.f32 %v498_v39, %v1686_v46 }
 0x1d3   :  { %v583_v54 = vmul.f32 %v519_v26, %v1686_v46  ;;  %v556_v42 = vmul.f32 %v1636_v9, %v1686_v46  ;;  %v555_v55 = vmul.f32 %v1634_v8, %v1686_v46  ;;  %v558_v57 = vmul.f32 %v1553_v27, %v1686_v46 }
 0x1d4   :  { %687 = vperm.xlu1 %1341, %v554_v50   ;;  %681 = vperm.xlu2 %1340, %v552_v48   ;;  %v559_v58 = vmul.f32 %v1642_v12, %v1686_v46  ;;  %v557_v59 = vmul.f32 %v1638_v10, %v1686_v46  ;;  %v561_v60 = vmul.f32 %v1640_v11, %v1686_v46 }
 0x1d5   :  { %684 = vperm.xlu0 %1339, %v553_v31   ;;  %v562_v61 = vmul.f32 %v1650_v16, %v1686_v46  ;;  %v560_v62 = vmul.f32 %v1646_v14, %v1686_v46  ;;  %v564_v63 = vmul.f32 %v1654_v36, %v1686_v46  ;;  %v565_v3 = vmul.f32 %v1648_v15, %v1686_v46 }
 0x1d6   :  { %v563_v34 = vmul.f32 %v1644_v4, %v1686_v46  ;;  %v567_v5 = vmul.f32 %v1558_v32, %v1686_v46  ;;  %v568_v6 = vmul.f32 %v1652_v18, %v1686_v46  ;;  %v566_v39 = vmul.f32 %v1658_v20, %v1686_v46 }
 0x1d7   :  { %v570_v0 = vmul.f32 %v1562_v37, %v1686_v46  ;;  %v571_v26 = vmul.f32 %v1656_v19, %v1686_v46  ;;  %v569_v28 = vmul.f32 %v1662_v22, %v1686_v46  ;;  %v573_v35 = vmul.f32 %v1569_v43, %v1686_v46 }
 0x1d8   :  { %v574_v44 = vmul.f32 %v1660_v21, %v1686_v46  ;;  %v572_v48 = vmul.f32 %v1666_v24, %v1686_v46  ;;  %v576_v31 = vmul.f32 %v1576_v49, %v1686_v46  ;;  %v577_v50 = vmul.f32 %v1664_v23, %v1686_v46 }
 0x1dc   :  { %693 = vperm.xlu1 %1341, %v556_v42   ;;  %690 = vperm.xlu2 %1340, %v555_v55   ;;  %v575_v42 = vmul.f32 %v1668_v25, %v1686_v46  ;;  %v579_v55 = vmul.f32 %v1582_v52, %v1686_v46 }
 0x1dd   :  { %699 = vperm.xlu0 %1339, %v558_v57   ;;  %v578_v57 = vmul.f32 %v1673_v33, %v1686_v46  ;;  %v586_v33 = vmul.f32 %v1632_v7, %v1671_v29  ;;  %v592_v7 = vmul.f32 %v1646_v14, %v1671_v29 }
 0x1e4   :  { %702 = vperm.xlu1 %1341, %v559_v58   ;;  %696 = vperm.xlu2 %1340, %v557_v59   ;;  %v582_v58 = vmul.f32 %v1586_v56, %v1686_v46  ;;  %v1748_v59 = vpop.permute.xlu2 %504 }
 0x1e5   :  { %708 = vperm.xlu0 %1339, %v561_v60   ;;  %v581_v60 = vmul.f32 %v1748_v59, %v1686_v46  ;;  %v589_v46 = vmul.f32 %v1638_v10, %v1671_v29  ;;  %v595_v10 = vmul.f32 %v1644_v4, %v1671_v29  ;;  %v598_v4 = vmul.f32 %v1658_v20, %v1671_v29 }
 0x1ec   :  { %711 = vperm.xlu1 %1341, %v562_v61   ;;  %705 = vperm.xlu2 %1340, %v560_v62   ;;  %v585_v61 = vmul.f32 %v1580_v51, %v1671_v29  ;;  %v584_v62 = vmul.f32 %v1573_v47, %v1671_v29  ;;  %v587_v51 = vmul.f32 %v1634_v8, %v1671_v29 }
 0x1ed   :  { %717 = vperm.xlu0 %1339, %v564_v63  }
 0x1f4   :  { %720 = vperm.xlu1 %1341, %v565_v3   ;;  %714 = vperm.xlu2 %1340, %v563_v34   ;;  %v594_v3 = vmul.f32 %v1650_v16, %v1671_v29  ;;  %v597_v34 = vmul.f32 %v1648_v15, %v1671_v29 }
 0x1f5   :  { %726 = vperm.xlu0 %1339, %v567_v5  }
 0x1fc   :  { %729 = vperm.xlu1 %1341, %v568_v6   ;;  %723 = vperm.xlu2 %1340, %v566_v39  }
 0x1fd   :  { %735 = vperm.xlu0 %1339, %v570_v0  }
 0x204   :  { %738 = vperm.xlu1 %1341, %v571_v26   ;;  %732 = vperm.xlu2 %1340, %v569_v28   ;;  %v600_v26 = vmul.f32 %v1652_v18, %v1671_v29 }
 0x205   :  { %744 = vperm.xlu0 %1339, %v573_v35  }
 0x20c   :  { %747 = vperm.xlu1 %1341, %v574_v44   ;;  %741 = vperm.xlu2 %1340, %v572_v48  }
 0x20d   :  { %753 = vperm.xlu0 %1339, %v576_v31  }
 0x214   :  { %756 = vperm.xlu1 %1341, %v577_v50   ;;  %750 = vperm.xlu2 %1340, %v575_v42   ;;  %v601_v42 = vmul.f32 %v1662_v22, %v1671_v29 }
 0x215   :  { %762 = vperm.xlu0 %1339, %v579_v55  }
 0x21c   :  { %765 = vperm.xlu1 %1341, %v580_v53   ;;  %759 = vperm.xlu2 %1340, %v578_v57   ;;  %v588_v53 = vmul.f32 %v1636_v9, %v1671_v29  ;;  %v590_v9 = vmul.f32 %v1553_v27, %v1671_v29  ;;  %v599_v57 = vmul.f32 %v1558_v32, %v1671_v29 }
 0x21d   :  { %771 = vperm.xlu0 %1339, %v582_v58  }
 0x224   :  { %774 = vperm.xlu1 %1341, %v583_v54   ;;  %768 = vperm.xlu2 %1340, %v581_v60   ;;  %v591_v54 = vmul.f32 %v1642_v12, %v1671_v29  ;;  %v593_v12 = vmul.f32 %v1640_v11, %v1671_v29  ;;  %v596_v11 = vmul.f32 %v1654_v36, %v1671_v29 }
 0x225   :  { %780 = vperm.xlu0 %1339, %v585_v61   ;;  %v603_v60 = vmul.f32 %v1656_v19, %v1671_v29  ;;  %v604_v19 = vmul.f32 %v1666_v24, %v1671_v29  ;;  %v605_v24 = vmul.f32 %v1569_v43, %v1671_v29 }
 0x22c   :  { %783 = vperm.xlu1 %1341, %v586_v33   ;;  %777 = vperm.xlu2 %1340, %v584_v62  }
 0x22d   :  { %789 = vperm.xlu0 %1339, %v588_v53  }
 0x22e   :  { %v682_v63 = vpop.permute.xlu2 %681 }
 0x22f   :  { %v872_v6 = vperm.slane %v682_v63, %v1605_v17 }
 0x234   :  { %792 = vperm.xlu1 %1341, %v589_v46   ;;  %786 = vperm.xlu2 %1340, %v587_v51   ;;  %v602_v46 = vmul.f32 %v1562_v37, %v1671_v29  ;;  %v609_v37 = vmul.f32 %v1664_v23, %v1671_v29 }
 0x235   :  { %798 = vperm.xlu0 %1339, %v591_v54   ;;  %v606_v54 = vmul.f32 %v1660_v21, %v1671_v29 }
 0x236   :  { %v691_v47 = vpop.permute.xlu2 %690 }
 0x237   :  { %v875_v15 = vperm.slane %v691_v47, %v1605_v17 }
 0x23c   :  { %801 = vperm.xlu1 %1341, %v592_v7   ;;  %795 = vperm.xlu2 %1340, %v590_v9  }
 0x23d   :  { %807 = vperm.xlu0 %1339, %v594_v3   ;;  %v607_v3 = vmul.f32 %v1668_v25, %v1671_v29 }
 0x23e   :  { %v697_v8 = vpop.permute.xlu2 %696 }
 0x23f   :  { %v877_v36 = vperm.slane %v697_v8, %v1605_v17 }
 0x244   :  { %810 = vperm.xlu1 %1341, %v595_v10   ;;  %804 = vperm.xlu2 %1340, %v593_v12   ;;  %v608_v12 = vmul.f32 %v1576_v49, %v1671_v29 }
 0x245   :  { %816 = vperm.xlu0 %1339, %v597_v34   ;;  %v613_v34 = vmul.f32 %v1748_v59, %v1671_v29 }
 0x246   :  { %v688_v27 = vpop.permute.xlu1 %687  ;;  %v706_v14 = vpop.permute.xlu2 %705 }
 0x247   :  { %v874_v16 = vperm.slane %v688_v27, %v1605_v17  ;;  %v685_v5 = vpop.permute.xlu0 %684  ;;  %v880_v53 = vperm.slane %v706_v14, %v1605_v17  ;;  %v611_v27 = vmul.f32 %v1582_v52, %v1671_v29 }
 0x248   :  { %v873_v39 = vperm.slane %v685_v5, %v1605_v17 }
 0x24a   :  { %v936_v0 = vsel %vm262_vm3, %v873_v39, %v872_v6 }
 0x24b   :  { %v938_v28 = vsel %vm937_vm5, %v874_v16, %v936_v0 }
 0x24c   :  { %819 = vperm.xlu1 %1341, %v598_v4   ;;  %813 = vperm.xlu2 %1340, %v596_v11   ;;  %v940_v35 = vsel %vm939_vm6, %v875_v15, %v938_v28 }
 0x24d   :  { %825 = vperm.xlu0 %1339, %v600_v26  }
 0x24e   :  { %v694_v20 = vpop.permute.xlu1 %693  ;;  %v1792_v48 = vpop.permute.xlu2 %714 }
 0x24f   :  { %v876_v44 = vperm.slane %v694_v20, %v1605_v17  ;;  %v700_v31 = vpop.permute.xlu0 %699 }
 0x250   :  { %v878_v50 = vperm.slane %v700_v31, %v1605_v17  ;;  %v883_v31 = vperm.slane %v1792_v48, %v1605_v17 }
 0x251   :  { %v942_v18 = vsel %vm941_vm7, %v876_v44, %v940_v35 }
 0x252   :  { %v944_v55 = vsel %vm943_vm8, %v877_v36, %v942_v18 }
 0x253   :  { %v946_v58 = vsel %vm945_vm9, %v878_v50, %v944_v55 }
 0x254   :  { %828 = vperm.xlu1 %1341, %v601_v42   ;;  %822 = vperm.xlu2 %1340, %v599_v57  }
 0x255   :  { %834 = vperm.xlu0 %1339, %v603_v60  }
 0x256   :  { %v703_v61 = vpop.permute.xlu1 %702  ;;  %v1806_v62 = vpop.permute.xlu2 %723 }
 0x257   :  { %v879_v33 = vperm.slane %v703_v61, %v1605_v17  ;;  %v709_v22 = vpop.permute.xlu0 %708 }
 0x258   :  { %v881_v63 = vperm.slane %v709_v22, %v1605_v17 }
 0x259   :  { %v1811_v32 = vsel %vm947_vm10, %v879_v33, %v946_v58 }
 0x25a   :  { %v949_v51 = vsel %vm262_vm3, %v881_v63, %v880_v53 }
 0x25c   :  { %837 = vperm.xlu1 %1341, %v604_v19   ;;  %831 = vperm.xlu2 %1340, %v602_v46  }
 0x25d   :  { %843 = vperm.xlu0 %1339, %v606_v54  }
 0x25e   :  { %v712_v47 = vpop.permute.xlu1 %711  ;;  %v733_v7 = vpop.permute.xlu2 %732 }
 0x25f   :  { %v1820_v9 = vpop.permute.xlu0 %717  ;;  %v889_v4 = vperm.slane %v733_v7, %v1605_v17 }
 0x260   :  { %v884_v48 = vperm.slane %v1820_v9, %v1605_v17  ;;  %v886_v9 = vperm.slane %v1806_v62, %v1605_v17 }
 0x264   :  { %846 = vperm.xlu1 %1341, %v607_v3   ;;  %840 = vperm.xlu2 %1340, %v605_v24  }
 0x265   :  { %852 = vperm.xlu0 %1339, %v609_v37  }
 0x266   :  { %v1828_v21 = vpop.permute.xlu1 %720  ;;  %v742_v8 = vpop.permute.xlu2 %741 }
 0x267   :  { %v1830_v10 = vpop.permute.xlu0 %726  ;;  %v892_v20 = vperm.slane %v742_v8, %v1605_v17  ;;  %v885_v60 = vperm.slane %v1828_v21, %v1605_v17  ;;  %v1007_v8 = vsel %vm1006_vm11, %v1811_v32, 0.0 }
 0x268   :  { %v887_v32 = vperm.slane %v1830_v10, %v1605_v17 }
 0x26c   :  { %855 = vperm.xlu1 %1341, %v1677_v38   ;;  %849 = vperm.xlu2 %1340, %v608_v12  }
 0x26d   :  { %861 = vperm.xlu0 %1339, %v1680_v40   ;;  %v614_v40 = vmul.f32 %v1586_v56, %v1671_v29 }
 0x26e   :  { %v730_v43 = vpop.permute.xlu1 %729  ;;  %v1836_v25 = vpop.permute.xlu2 %750 }
 0x26f   :  { %v736_v23 = vpop.permute.xlu0 %735  ;;  %v895_v54 = vperm.slane %v1836_v25, %v1605_v17 }
 0x270   :  { %v890_v11 = vperm.slane %v736_v23, %v1605_v17 }
 0x274   :  { %864 = vperm.xlu1 %1341, %v613_v34   ;;  %858 = vperm.xlu2 %1340, %v611_v27  }
 0x275   :  { %870 = vperm.xlu0 %1339, %v1683_v41   ;;  %v888_v41 = vperm.slane %v730_v43, %v1605_v17 }
 0x276   :  { %v739_v49 = vpop.permute.xlu1 %738  ;;  %v760_v14 = vpop.permute.xlu2 %759 }
 0x277   :  { %v745_v38 = vpop.permute.xlu0 %744  ;;  %v956_v56 = vsel %vm262_vm3, %v889_v4, %v888_v41  ;;  %v898_v18 = vperm.slane %v760_v14, %v1605_v17 }
 0x278   :  { %v957_v26 = vsel %vm937_vm5, %v890_v11, %v956_v56  ;;  %v893_v55 = vperm.slane %v745_v38, %v1605_v17 }
 0x27c   :  { %1343 = vset.pattern.permute.xlu1 %v1497_v2  ;;  %867 = vperm.xlu2 %1340, %v614_v40   ;;  %v891_v2 = vperm.slane %v739_v49, %v1605_v17 }
 0x27d   :  { %1342 = vset.pattern.permute.xlu0 %v1493_v1  ;;  %v882_v1 = vperm.slane %v712_v47, %v1605_v17 }
 0x27e   :  { %v748_v16 = vpop.permute.xlu1 %747  ;;  %v769_v59 = vpop.permute.xlu2 %768  ;;  %v958_v28 = vsel %vm939_vm6, %v891_v2, %v957_v26 }
 0x27f   :  { %v754_v5 = vpop.permute.xlu0 %753  ;;  %v950_v44 = vsel %vm937_vm5, %v882_v1, %v949_v51  ;;  %v959_v50 = vsel %vm941_vm7, %v892_v20, %v958_v28  ;;  %v894_v42 = vperm.slane %v748_v16, %v1605_v17  ;;  %v901_v24 = vperm.slane %v769_v59, %v1605_v17 }
 0x280   :  { %v896_v35 = vperm.slane %v754_v5, %v1605_v17  ;;  %v951_v58 = vsel %vm939_vm6, %v883_v31, %v950_v44  ;;  %v960_v53 = vsel %vm943_vm8, %v893_v55, %v959_v50 }
 0x281   :  { %v961_v46 = vsel %vm945_vm9, %v894_v42, %v960_v53  ;;  %v952_v51 = vsel %vm941_vm7, %v884_v48, %v951_v58 }
 0x282   :  { %v953_v7 = vsel %vm943_vm8, %v885_v60, %v952_v51  ;;  %v962_v37 = vsel %vm947_vm10, %v895_v54, %v961_v46 }
 0x283   :  { %v954_v25 = vsel %vm945_vm9, %v886_v9, %v953_v7  ;;  %v1013_v14 = vsel %vm1006_vm11, %v962_v37, 0.0 }
 0x284   :  { %1344 = vset.pattern.permute.xlu2 %v1501_v13  ;;  %v955_v5 = vsel %vm947_vm10, %v887_v32, %v954_v25 }
 0x285   :  { %v1010_v41 = vsel %vm1006_vm11, %v955_v5, 0.0 }
 0x286   :  { %v757_v52 = vpop.permute.xlu1 %756  ;;  %v778_v6 = vpop.permute.xlu2 %777 }
 0x287   :  { %v763_v39 = vpop.permute.xlu0 %762  ;;  %v897_v0 = vperm.slane %v757_v52, %v1605_v17  ;;  %v904_v34 = vperm.slane %v778_v6, %v1605_v17 }
 0x288   :  { %v899_v63 = vperm.slane %v763_v39, %v1605_v17 }
 0x289   :  { %v963_v36 = vsel %vm262_vm3, %v897_v0, %v896_v35 }
 0x28a   :  { %v964_v61 = vsel %vm937_vm5, %v898_v18, %v963_v36 }
 0x28b   :  { %v965_v47 = vsel %vm939_vm6, %v899_v63, %v964_v61 }
 0x28e   :  { %v766_v29 = vpop.permute.xlu1 %765  ;;  %v787_v15 = vpop.permute.xlu2 %786 }
 0x28f   :  { %v772_v13 = vpop.permute.xlu0 %771  ;;  %v900_v33 = vperm.slane %v766_v29, %v1605_v17  ;;  %v907_v6 = vperm.slane %v787_v15, %v1605_v17 }
 0x290   :  { %v902_v62 = vperm.slane %v772_v13, %v1605_v17 }
 0x291   :  { %v966_v3 = vsel %vm941_vm7, %v900_v33, %v965_v47 }
 0x292   :  { %v967_v23 = vsel %vm943_vm8, %v901_v24, %v966_v3 }
 0x293   :  { %v968_v16 = vsel %vm945_vm9, %v902_v62, %v967_v23 }
 0x296   :  { %v775_v57 = vpop.permute.xlu1 %774  ;;  %v796_v22 = vpop.permute.xlu2 %795 }
 0x297   :  { %v781_v19 = vpop.permute.xlu0 %780  ;;  %v903_v12 = vperm.slane %v775_v57, %v1605_v17  ;;  %v910_v2 = vperm.slane %v796_v22, %v1605_v17  ;;  %v1928_v22 = vld [vmem:[%s2015_s4] ss:$0 sm:$0xff]  ;;  %s1455_s4 = smov [#allocation5]  }
 0x298   :  { %v905_v21 = vperm.slane %v781_v19, %v1605_v17  ;;  %s1297_s10 = sshll.u32 %s1455_s4, 4  ;;  %s1298_s10 = int_to_ptr.vmem [resolvable:$true] %s1297_s10 }
 0x299   :  { %v969_v52 = vsel %vm947_vm10, %v903_v12, %v968_v16 }
 0x29a   :  { %v970_v40 = vsel %vm262_vm3, %v905_v21, %v904_v34  ;;  %v1016_v10 = vsel %vm1006_vm11, %v969_v52, 0.0 }
 0x29e   :  { %v784_v43 = vpop.permute.xlu1 %783  ;;  %1008 = vadd.xlane.f32.xlu1 %v1007_v8  ;;  %v805_v49 = vpop.permute.xlu2 %804 }
 0x29f   :  { %v906_v27 = vperm.slane %v784_v43, %v1605_v17  ;;  %1014 = vadd.xlane.f32.xlu0 %v1013_v14  ;;  %v790_v38 = vpop.permute.xlu0 %789  ;;  %v913_v18 = vperm.slane %v805_v49, %v1605_v17 }
 0x2a0   :  { %v908_v4 = vperm.slane %v790_v38, %v1605_v17 }
 0x2a1   :  { %v971_v59 = vsel %vm937_vm5, %v906_v27, %v970_v40 }
 0x2a2   :  { %v972_v39 = vsel %vm939_vm6, %v907_v6, %v971_v59 }
 0x2a3   :  { %v973_v29 = vsel %vm941_vm7, %v908_v4, %v972_v39 }
 0x2a5   :  { %1011 = vadd.xlane.f32.xlu2 %v1010_v41 }
 0x2a6   :  { %v793_v11 = vpop.permute.xlu1 %792  ;;  %1017 = vadd.xlane.f32.xlu1 %v1016_v10  ;;  %v814_v0 = vpop.permute.xlu2 %813 }
 0x2a7   :  { %v909_v56 = vperm.slane %v793_v11, %v1605_v17  ;;  %v799_v1 = vpop.permute.xlu0 %798  ;;  %v916_v33 = vperm.slane %v814_v0, %v1605_v17 }
 0x2a8   :  { %v911_v13 = vperm.slane %v799_v1, %v1605_v17 }
 0x2a9   :  { %v974_v15 = vsel %vm943_vm8, %v909_v56, %v973_v29 }
 0x2aa   :  { %v975_v26 = vsel %vm945_vm9, %v910_v2, %v974_v15 }
 0x2ab   :  { %v976_v28 = vsel %vm947_vm10, %v911_v13, %v975_v26 }
 0x2ac   :  { %v1019_v35 = vsel %vm1006_vm11, %v976_v28, 0.0 }
 0x2ad   :  { %1020 = vadd.xlane.f32.xlu2 %v1019_v35 }
 0x2ae   :  { %v802_v20 = vpop.permute.xlu1 %801  ;;  %v823_v31 = vpop.permute.xlu2 %822 }
 0x2af   :  { %v808_v44 = vpop.permute.xlu0 %807  ;;  %v912_v36 = vperm.slane %v802_v20, %v1605_v17  ;;  %v919_v51 = vperm.slane %v823_v31, %v1605_v17 }
 0x2b0   :  { %v914_v50 = vperm.slane %v808_v44, %v1605_v17 }
 0x2b1   :  { %v977_v42 = vsel %vm262_vm3, %v913_v18, %v912_v36 }
 0x2b2   :  { %v978_v60 = vsel %vm937_vm5, %v914_v50, %v977_v42 }
 0x2b6   :  { %v811_v55 = vpop.permute.xlu1 %810  ;;  %v832_v48 = vpop.permute.xlu2 %831 }
 0x2b7   :  { %v915_v57 = vperm.slane %v811_v55, %v1605_v17  ;;  %v817_v58 = vpop.permute.xlu0 %816  ;;  %v922_v27 = vperm.slane %v832_v48, %v1605_v17 }
 0x2b8   :  { %v917_v63 = vperm.slane %v817_v58, %v1605_v17 }
 0x2b9   :  { %v979_v61 = vsel %vm939_vm6, %v915_v57, %v978_v60 }
 0x2ba   :  { %v980_v53 = vsel %vm941_vm7, %v916_v33, %v979_v61 }
 0x2bb   :  { %v981_v54 = vsel %vm943_vm8, %v917_v63, %v980_v53 }
 0x2be   :  { %v820_v19 = vpop.permute.xlu1 %819  ;;  %v841_v37 = vpop.permute.xlu2 %840 }
 0x2bf   :  { %v918_v46 = vperm.slane %v820_v19, %v1605_v17  ;;  %1043 = vperm.xlu1 %1343, %v1928_v22   ;;  %v826_v47 = vpop.permute.xlu0 %825  ;;  %v925_v52 = vperm.slane %v841_v37, %v1605_v17 }
 0x2c0   :  { %v920_v23 = vperm.slane %v826_v47, %v1605_v17 }
 0x2c1   :  { %v982_v7 = vsel %vm945_vm9, %v918_v46, %v981_v54 }
 0x2c2   :  { %v983_v3 = vsel %vm947_vm10, %v919_v51, %v982_v7 }
 0x2c3   :  { %v1022_v9 = vsel %vm1006_vm11, %v983_v3, 0.0 }
 0x2c4   :  { %1023 = vadd.xlane.f32.xlu0 %v1022_v9 }
 0x2c6   :  { %v829_v24 = vpop.permute.xlu1 %828  ;;  %v850_v43 = vpop.permute.xlu2 %849 }
 0x2c7   :  { %1345 = vset.pattern.permute.xlu1 %v1508_v30  ;;  %v835_v21 = vpop.permute.xlu0 %834  ;;  %v921_v25 = vperm.slane %v829_v24, %v1605_v17  ;;  %v928_v6 = vperm.slane %v850_v43, %v1605_v17 }
 0x2c8   :  { %v923_v32 = vperm.slane %v835_v21, %v1605_v17 }
 0x2c9   :  { %v984_v62 = vsel %vm262_vm3, %v921_v25, %v920_v23 }
 0x2ca   :  { %v985_v14 = vsel %vm937_vm5, %v922_v27, %v984_v62 }
 0x2cb   :  { %v986_v40 = vsel %vm939_vm6, %v923_v32, %v985_v14 }
 0x2ce   :  { %v838_v8 = vpop.permute.xlu1 %837  ;;  %v859_v38 = vpop.permute.xlu2 %858 }
 0x2cf   :  { %v844_v12 = vpop.permute.xlu0 %843  ;;  %v924_v30 = vperm.slane %v838_v8, %v1605_v17  ;;  %v931_v29 = vperm.slane %v859_v38, %v1605_v17 }
 0x2d0   :  { %v926_v56 = vperm.slane %v844_v12, %v1605_v17 }
 0x2d1   :  { %v987_v59 = vsel %vm941_vm7, %v924_v30, %v986_v40 }
 0x2d2   :  { %v988_v11 = vsel %vm943_vm8, %v925_v52, %v987_v59 }
 0x2d3   :  { %v989_v1 = vsel %vm945_vm9, %v926_v56, %v988_v11 }
 0x2d6   :  { %v847_v34 = vpop.permute.xlu1 %846  ;;  %v868_v15 = vpop.permute.xlu2 %867 }
 0x2d7   :  { %v853_v49 = vpop.permute.xlu0 %852  ;;  %v927_v10 = vperm.slane %v847_v34, %v1605_v17  ;;  %v934_v20 = vperm.slane %v868_v15, %v1605_v17 }
 0x2d8   :  { %1037 = vperm.xlu0 %1342, %v1928_v22   ;;  %v929_v16 = vperm.slane %v853_v49, %v1605_v17 }
 0x2d9   :  { %v990_v13 = vsel %vm947_vm10, %v927_v10, %v989_v1 }
 0x2da   :  { %v991_v4 = vsel %vm262_vm3, %v929_v16, %v928_v6  ;;  %v1025_v31 = vsel %vm1006_vm11, %v990_v13, 0.0 }
 0x2de   :  { %v856_v5 = vpop.permute.xlu1 %855 }
 0x2df   :  { %v930_v39 = vperm.slane %v856_v5, %v1605_v17  ;;  %v862_v41 = vpop.permute.xlu0 %861 }
 0x2e0   :  { %1348 = vset.pattern.permute.xlu0 %v1454_v45  ;;  %v932_v26 = vperm.slane %v862_v41, %v1605_v17 }
 0x2e1   :  { %v992_v2 = vsel %vm937_vm5, %v930_v39, %v991_v4 }
 0x2e2   :  { %v993_v0 = vsel %vm939_vm6, %v931_v29, %v992_v2 }
 0x2e3   :  { %v994_v44 = vsel %vm941_vm7, %v932_v26, %v993_v0 }
 0x2e6   :  { %v865_v28 = vpop.permute.xlu1 %864 }
 0x2e7   :  { %v933_v35 = vperm.slane %v865_v28, %v1605_v17  ;;  %v871_v36 = vpop.permute.xlu0 %870 }
 0x2e8   :  { %v935_v50 = vperm.slane %v871_v36, %v1605_v17 }
 0x2e9   :  { %v995_v18 = vsel %vm943_vm8, %v933_v35, %v994_v44  ;;  %1026 = vadd.xlane.f32.xlu1 %v1025_v31 }
 0x2ea   :  { %v996_v42 = vsel %vm945_vm9, %v934_v20, %v995_v18 }
 0x2eb   :  { %v997_v55 = vsel %vm947_vm10, %v935_v50, %v996_v42 }
 0x2ec   :  { %v1028_v57 = vsel %vm1006_vm11, %v997_v55, 0.0 }
 0x2ed   :  { %1029 = vadd.xlane.f32.xlu2 %v1028_v57 }
 0x302   :  { %1055 = vperm.xlu1 %1345, %v1928_v22  }
 0x305   :  { %1049 = vperm.xlu2 %1344, %v1928_v22  }
 0x30a   :  { %1347 = vset.pattern.permute.xlu1 %v1454_v45 }
 0x30d   :  { %1346 = vset.pattern.permute.xlu2 %v1454_v45 }
 0x311   :  { %v1009_v58 = vpop.xlane.xlu1 %1008 }
 0x312   :  { %v1980_v53 = vpop.xlane.xlu0 %1014 }
 0x318   :  { %v1012_v17 = vpop.xlane.xlu2 %1011 }
 0x319   :  { %v1978_v60 = vpop.xlane.xlu1 %1017 }
 0x320   :  { %v1021_v7 = vpop.xlane.xlu2 %1020 }
 0x331   :  { %v1044_v61 = vpop.permute.xlu1 %1043 }
 0x332   :  { %v1062_v33 = vadd.f32 %v1044_v61, %v1012_v17 }
 0x334   :  { %v1313_v48 = vmul.f32 -1.442695, %v1062_v33 }
 0x336   :  { %1351 = vpow2.f32 %v1313_v48 }
 0x337   :  { %v1024_v46 = vpop.xlane.xlu0 %1023 }
 0x338   :  { %v1066_v14 = vadd.f32 %v1044_v61, %v1024_v46 }
 0x33a   :  { %v1317_v59 = vmul.f32 -1.442695, %v1066_v14 }
 0x33c   :  { %v1352_v63 = vpop.eup %1351 }
 0x33d   :  { %v1094_v19 = vadd.f32 1.0, %v1352_v63 }
 0x33f   :  { %1353 = vrcp.f32 %v1094_v19  ;;  %v1127_v47 = vand.u32 2147483648, %v1094_v19  ;;  %v1125_v9 = vand.u32 2147483647, %v1094_v19  ;;  %vm1121_vm13 = vweird.f32 %v1094_v19 }
 0x341   :  { %v1128_v43 = vor.u32 1.1754944e-38, %v1127_v47  ;;  %vm1126_vm15 = vcmp.eq.f32.partialorder %v1125_v9, 8.507059e+37 }
 0x345   :  { %v1354_v51 = vpop.eup %1353 }
 0x346   :  { %v1117_v22 = vmul.f32 %v1354_v51, %v1094_v19  ;;  %vm1122_vm12 = vweird.f32 %v1354_v51 }
 0x347   :  { %vm1123_vm14 = vmor %vm1121_vm13, %vm1122_vm12 }
 0x348   :  { %v1118_v54 = vsub.f32 1.0, %v1117_v22 }
 0x34a   :  { %v1038_v45 = vpop.permute.xlu0 %1037  ;;  %v1119_v3 = vmul.f32 %v1354_v51, %v1118_v54 }
 0x34b   :  { %v1061_v24 = vadd.f32 %v1038_v45, %v1009_v58  ;;  %v1065_v37 = vadd.f32 %v1038_v45, %v1021_v7 }
 0x34c   :  { %v1120_v21 = vadd.f32 %v1354_v51, %v1119_v3 }
 0x34d   :  { %v1312_v8 = vmul.f32 -1.442695, %v1061_v24  ;;  %v1316_v12 = vmul.f32 -1.442695, %v1065_v37 }
 0x34e   :  { %v1124_v25 = vsel %vm1123_vm14, %v1354_v51, %v1120_v21 }
 0x34f   :  { %1355 = vpow2.f32 %v1312_v8  ;;  %v1129_v23 = vsel %vm1126_vm15, %v1128_v43, %v1124_v25 }
 0x350   :  { %1357 = vpow2.f32 %v1316_v12  ;;  %1228 = vperm.xlu1 %1347, %v1129_v23  }
 0x355   :  { %v1356_v34 = vpop.eup %1355 }
 0x356   :  { %v1358_v62 = vpop.eup %1357  ;;  %v1093_v27 = vadd.f32 1.0, %v1356_v34 }
 0x357   :  { %v1097_v49 = vadd.f32 1.0, %v1358_v62 }
 0x358   :  { %1359 = vrcp.f32 %v1093_v27  ;;  %v1112_v6 = vand.u32 2147483648, %v1093_v27  ;;  %v1110_v10 = vand.u32 2147483647, %v1093_v27  ;;  %vm1106_vm2 = vweird.f32 %v1093_v27 }
 0x359   :  { %1361 = vrcp.f32 %v1097_v49  ;;  %v1172_v39 = vand.u32 2147483648, %v1097_v49  ;;  %v1170_v11 = vand.u32 2147483647, %v1097_v49  ;;  %vm1166_vm3 = vweird.f32 %v1097_v49 }
 0x35a   :  { %1363 = vpow2.f32 %v1317_v59  ;;  %v1113_v29 = vor.u32 1.1754944e-38, %v1112_v6  ;;  %vm1111_vm6 = vcmp.eq.f32.partialorder %v1110_v10, 8.507059e+37 }
 0x35b   :  { %v1173_v1 = vor.u32 1.1754944e-38, %v1172_v39  ;;  %vm1171_vm7 = vcmp.eq.f32.partialorder %v1170_v11, 8.507059e+37 }
 0x35c   :  { %v1027_v0 = vpop.xlane.xlu1 %1026 }
 0x35e   :  { %v1360_v30 = vpop.eup %1359 }
 0x35f   :  { %v1362_v32 = vpop.eup %1361  ;;  %v1102_v38 = vmul.f32 %v1360_v30, %v1093_v27  ;;  %vm1107_vm0 = vweird.f32 %v1360_v30 }
 0x360   :  { %v1030_v40 = vpop.xlane.xlu2 %1029  ;;  %v1162_v16 = vmul.f32 %v1362_v32, %v1097_v49  ;;  %vm1167_vm1 = vweird.f32 %v1362_v32  ;;  %vm1108_vm4 = vmor %vm1106_vm2, %vm1107_vm0  ;;  %v1364_v36 = vpop.eup %1363 }
 0x361   :  { %v1103_v5 = vsub.f32 1.0, %v1102_v38  ;;  %vm1168_vm5 = vmor %vm1166_vm3, %vm1167_vm1  ;;  %v1983_v50 = vadd.f32 1.0, %v1364_v36 }
 0x362   :  { %v1163_v52 = vsub.f32 1.0, %v1162_v16 }
 0x363   :  { %v1104_v41 = vmul.f32 %v1360_v30, %v1103_v5  ;;  %v1187_v59 = vand.u32 2147483648, %v1983_v50  ;;  %vm1181_vm1 = vweird.f32 %v1983_v50 }
 0x364   :  { %v1164_v4 = vmul.f32 %v1362_v32, %v1163_v52  ;;  %v1185_v52 = vand.u32 2147483647, %v1983_v50 }
 0x365   :  { %v1105_v56 = vadd.f32 %v1360_v30, %v1104_v41 }
 0x366   :  { %v1165_v2 = vadd.f32 %v1362_v32, %v1164_v4  ;;  %v1188_v4 = vor.u32 1.1754944e-38, %v1187_v59  ;;  %vm1186_vm3 = vcmp.eq.f32.partialorder %v1185_v52, 8.507059e+37 }
 0x367   :  { %v1109_v15 = vsel %vm1108_vm4, %v1360_v30, %v1105_v56 }
 0x368   :  { %v1050_v13 = vpop.permute.xlu2 %1049  ;;  %v1169_v26 = vsel %vm1168_vm5, %v1362_v32, %v1165_v2  ;;  %v1114_v28 = vsel %vm1111_vm6, %v1113_v29, %v1109_v15 }
 0x369   :  { %v1063_v35 = vadd.f32 %v1050_v13, %v1980_v53  ;;  %v1067_v20 = vadd.f32 %v1050_v13, %v1027_v0  ;;  %v1174_v44 = vsel %vm1171_vm7, %v1173_v1, %v1169_v26  ;;  %1223 = vperm.xlu2 %1346, %v1114_v28  }
 0x36a   :  { %1243 = vperm.xlu1 %1347, %v1174_v44  }
 0x36b   :  { %v1314_v31 = vmul.f32 -1.442695, %v1063_v35  ;;  %v1318_v18 = vmul.f32 -1.442695, %v1067_v20 }
 0x36d   :  { %1365 = vpow2.f32 %v1314_v31 }
 0x36e   :  { %1367 = vpow2.f32 %v1318_v18 }
 0x36f   :  { %1369 = vrcp.f32 %v1983_v50 }
 0x373   :  { %v1366_v42 = vpop.eup %1365 }
 0x374   :  { %v1368_v55 = vpop.eup %1367  ;;  %v1095_v57 = vadd.f32 1.0, %v1366_v42  ;;  %v1056_v58 = vpop.permute.xlu1 %1055  ;;  %v1383_v42 = vld [vmem:[#allocation2 + $0x10] sm:$0xff] }
 0x375   :  { %v1099_v17 = vadd.f32 1.0, %v1368_v55  ;;  %v1064_v61 = vadd.f32 %v1056_v58, %v1978_v60  ;;  %v1068_v33 = vadd.f32 %v1056_v58, %v1030_v40  ;;  %v1987_v63 = vpop.eup %1369 }
 0x376   :  { %1371 = vrcp.f32 %v1095_v57  ;;  %v1177_v19 = vmul.f32 %v1987_v63, %v1983_v50  ;;  %v1140_v24 = vand.u32 2147483647, %v1095_v57  ;;  %v1142_v37 = vand.u32 2147483648, %v1095_v57 }
 0x377   :  { %1373 = vrcp.f32 %v1099_v17  ;;  %v1315_v48 = vmul.f32 -1.442695, %v1064_v61  ;;  %v1319_v53 = vmul.f32 -1.442695, %v1068_v33  ;;  %v1202_v8 = vand.u32 2147483648, %v1099_v17  ;;  %v1385_v61 = vld [vmem:[#allocation2] sm:$0xff] }
 0x378   :  { %v1178_v45 = vsub.f32 1.0, %v1177_v19  ;;  %v1200_v25 = vand.u32 2147483647, %v1099_v17  ;;  %vm1136_vm10 = vweird.f32 %v1095_v57  ;;  %vm1196_vm11 = vweird.f32 %v1099_v17  ;;  %v1387_v19 = vld [vmem:[#allocation2 + $0x40] sm:$0xff] }
 0x379   :  { %1375 = vpow2.f32 %v1315_v48  ;;  %v1143_v27 = vor.u32 1.1754944e-38, %v1142_v37  ;;  %v1203_v49 = vor.u32 1.1754944e-38, %v1202_v8  ;;  %vm1141_vm14 = vcmp.eq.f32.partialorder %v1140_v24, 8.507059e+37  ;;  %v1386_v48 = vld [vmem:[#allocation2 + $0x8] sm:$0xff]  ;;  %v1392_v37 = vld [vmem:[#allocation2 + $0x58] sm:$0xff] }
 0x37a   :  { %1377 = vpow2.f32 %v1319_v53  ;;  %v1179_v34 = vmul.f32 %v1987_v63, %v1178_v45  ;;  %vm1201_vm15 = vcmp.eq.f32.partialorder %v1200_v25, 8.507059e+37  ;;  %vm1182_vm0 = vweird.f32 %v1987_v63  ;;  %v1390_v45 = vld [vmem:[#allocation2 + $0x28] sm:$0xff]  ;;  %v1394_v25 = vld [vmem:[#allocation2 + $0x78] sm:$0xff] }
 0x37b   :  { %vm1183_vm2 = vmor %vm1181_vm1, %vm1182_vm0 }
 0x37c   :  { %v1372_v46 = vpop.eup %1371  ;;  %v1180_v40 = vadd.f32 %v1987_v63, %v1179_v34 }
 0x37d   :  { %v1374_v51 = vpop.eup %1373  ;;  %v1132_v22 = vmul.f32 %v1372_v46, %v1095_v57  ;;  %vm1137_vm8 = vweird.f32 %v1372_v46  ;;  %v1384_v57 = vld [vmem:[#allocation2 + $0x18] sm:$0xff] }
 0x37e   :  { %v1192_v54 = vmul.f32 %v1374_v51, %v1099_v17  ;;  %vm1197_vm9 = vweird.f32 %v1374_v51  ;;  %vm1138_vm12 = vmor %vm1136_vm10, %vm1137_vm8  ;;  %v1184_v41 = vsel %vm1183_vm2, %v1987_v63, %v1180_v40  ;;  %v1398_v40 = vld [vmem:[#allocation2 + $0x38] sm:$0xff] }
 0x37f   :  { %v1376_v47 = vpop.eup %1375  ;;  %v1133_v7 = vsub.f32 1.0, %v1132_v22  ;;  %vm1198_vm13 = vmor %vm1196_vm11, %vm1197_vm9  ;;  %v1189_v1 = vsel %vm1186_vm3, %v1188_v4, %v1184_v41 }
 0x380   :  { %v1378_v60 = vpop.eup %1377  ;;  %v1096_v3 = vadd.f32 1.0, %v1376_v47  ;;  %v1193_v9 = vsub.f32 1.0, %v1192_v54  ;;  %v1389_v47 = vld [vmem:[#allocation2 + $0x20] sm:$0xff] }
 0x381   :  { %v1991_v21 = vadd.f32 1.0, %v1378_v60  ;;  %v1134_v12 = vmul.f32 %v1372_v46, %v1133_v7 }
 0x382   :  { %1379 = vrcp.f32 %v1096_v3  ;;  %v1194_v43 = vmul.f32 %v1374_v51, %v1193_v9  ;;  %v1157_v11 = vand.u32 2147483648, %v1096_v3  ;;  %v1155_v29 = vand.u32 2147483647, %v1096_v3  ;;  %v1391_v9 = vld [vmem:[#allocation2 + $0x50] sm:$0xff] }
 0x383   :  { %1381 = vrcp.f32 %v1991_v21  ;;  %v1135_v23 = vadd.f32 %v1372_v46, %v1134_v12  ;;  %vm1151_vm5 = vweird.f32 %v1096_v3  ;;  %v1217_v28 = vand.u32 2147483648, %v1991_v21  ;;  %v1393_v12 = vld [vmem:[#allocation2 + $0x70] sm:$0xff] }
 0x384   :  { %v1195_v62 = vadd.f32 %v1374_v51, %v1194_v43  ;;  %v1158_v13 = vor.u32 1.1754944e-38, %v1157_v11  ;;  %vm1156_vm8 = vcmp.eq.f32.partialorder %v1155_v29, 8.507059e+37  ;;  %vm1211_vm9 = vweird.f32 %v1991_v21 }
 0x385   :  { %v1139_v14 = vsel %vm1138_vm12, %v1372_v46, %v1135_v23  ;;  %v1215_v20 = vand.u32 2147483647, %v1991_v21  ;;  %v1218_v31 = vor.u32 1.1754944e-38, %v1217_v28 }
 0x386   :  { %v1199_v30 = vsel %vm1198_vm13, %v1374_v51, %v1195_v62  ;;  %v1144_v32 = vsel %vm1141_vm14, %v1143_v27, %v1139_v14  ;;  %v1388_v51 = vld [vmem:[#allocation2 + $0x48] sm:$0xff]  ;;  %v1395_v62 = vld [vmem:[#allocation2 + $0x60] sm:$0xff] }
 0x387   :  { %v1204_v38 = vsel %vm1201_vm15, %v1203_v49, %v1199_v30  ;;  %1233 = vperm.xlu2 %1346, %v1144_v32   ;;  %vm1216_vm11 = vcmp.eq.f32.partialorder %v1215_v20, 8.507059e+37  ;;  %v1396_v49 = vld [vmem:[#allocation2 + $0x68] sm:$0xff]  ;;  %v1397_v32 = vld [vmem:[#allocation2 + $0x30] sm:$0xff] }
 0x388   :  { %v1380_v16 = vpop.eup %1379  ;;  %1253 = vperm.xlu1 %1347, %v1204_v38  }
 0x389   :  { %v1382_v5 = vpop.eup %1381  ;;  %v1147_v6 = vmul.f32 %v1380_v16, %v1096_v3  ;;  %vm1152_vm4 = vweird.f32 %v1380_v16 }
 0x38a   :  { %v1207_v39 = vmul.f32 %v1382_v5, %v1991_v21  ;;  %vm1212_vm6 = vweird.f32 %v1382_v5  ;;  %vm1153_vm7 = vmor %vm1151_vm5, %vm1152_vm4 }
 0x38b   :  { %v1148_v10 = vsub.f32 1.0, %v1147_v6  ;;  %vm1213_vm10 = vmor %vm1211_vm9, %vm1212_vm6 }
 0x38c   :  { %v1208_v56 = vsub.f32 1.0, %v1207_v39 }
 0x38d   :  { %v1149_v2 = vmul.f32 %v1380_v16, %v1148_v10 }
 0x38e   :  { %v1209_v15 = vmul.f32 %v1382_v5, %v1208_v56 }
 0x38f   :  { %1248 = vperm.xlu2 %1346, %v1189_v1   ;;  %v1150_v0 = vadd.f32 %v1380_v16, %v1149_v2 }
 0x390   :  { %v1210_v26 = vadd.f32 %v1382_v5, %v1209_v15 }
 0x391   :  { %v1154_v35 = vsel %vm1153_vm7, %v1380_v16, %v1150_v0 }
 0x392   :  { %v1159_v44 = vsel %vm1156_vm8, %v1158_v13, %v1154_v35  ;;  %v1214_v36 = vsel %vm1213_vm10, %v1382_v5, %v1210_v26 }
 0x393   :  { %1238 = vperm.xlu0 %1348, %v1159_v44   ;;  %v1219_v18 = vsel %vm1216_vm11, %v1218_v31, %v1214_v36 }
 0x397   :  { %1258 = vperm.xlu2 %1346, %v1219_v18  }
 0x3c2   :  { %v1229_v50 = vpop.permute.xlu1 %1228 }
 0x3c3   :  { %v1263_v55 = vmul.f32 %v1383_v42, %v1229_v50  ;;  %v1264_v58 = vmul.f32 %v1384_v57, %v1229_v50  ;;  %v1224_v17 = vpop.permute.xlu2 %1223 }
 0x3c4   :  { %v1261_v33 = vmul.f32 %v1385_v61, %v1224_v17  ;;  %v1262_v53 = vmul.f32 %v1386_v48, %v1224_v17 }
 0x3c5   :  { %1279 = vst [vmem:[#allocation5 + $0x10] sm:$0xff] %v1263_v55 }
 0x3c6   :  { %1280 = vst [vmem:[#allocation5 + $0x18] sm:$0xff] %v1264_v58 }
 0x3c7   :  { %1277 = vst [vmem:[#allocation5] sm:$0xff] %v1261_v33 }
 0x3c8   :  { %1278 = vst [vmem:[#allocation5 + $0x8] sm:$0xff] %v1262_v53 }
 0x3dc   :  { %v1244_v63 = vpop.permute.xlu1 %1243 }
 0x3dd   :  { %v1269_v46 = vmul.f32 %v1387_v19, %v1244_v63  ;;  %v1270_v22 = vmul.f32 %v1388_v51, %v1244_v63 }
 0x3df   :  { %1285 = vst [vmem:[#allocation5 + $0x40] sm:$0xff] %v1269_v46 }
 0x3e0   :  { %1286 = vst [vmem:[#allocation5 + $0x48] sm:$0xff] %v1270_v22 }
 0x3e1   :  { %v1234_v54 = vpop.permute.xlu2 %1233 }
 0x3e2   :  { %v1265_v7 = vmul.f32 %v1389_v47, %v1234_v54  ;;  %v1266_v60 = vmul.f32 %v1390_v45, %v1234_v54 }
 0x3e4   :  { %1281 = vst [vmem:[#allocation5 + $0x20] sm:$0xff] %v1265_v7 }
 0x3e5   :  { %1282 = vst [vmem:[#allocation5 + $0x28] sm:$0xff] %v1266_v60 }
 0x3e9   :  { %v1249_v3 = vpop.permute.xlu2 %1248 }
 0x3ea   :  { %v1271_v24 = vmul.f32 %v1391_v9, %v1249_v3  ;;  %v1272_v21 = vmul.f32 %v1392_v37, %v1249_v3 }
 0x3ec   :  { %1287 = vst [vmem:[#allocation5 + $0x50] sm:$0xff] %v1271_v24 }
 0x3ed   :  { %1288 = vst [vmem:[#allocation5 + $0x58] sm:$0xff] %v1272_v21 }
 0x3f1   :  { %v1259_v8 = vpop.permute.xlu2 %1258 }
 0x3f2   :  { %v1275_v43 = vmul.f32 %v1393_v12, %v1259_v8  ;;  %v1276_v23 = vmul.f32 %v1394_v25, %v1259_v8 }
 0x3f4   :  { %1291 = vst [vmem:[#allocation5 + $0x70] sm:$0xff] %v1275_v43 }
 0x3f5   :  { %1292 = vst [vmem:[#allocation5 + $0x78] sm:$0xff] %v1276_v23 }
 0x3fa   :  { %v1254_v34 = vpop.permute.xlu1 %1253 }
 0x3fb   :  { %v1273_v27 = vmul.f32 %v1395_v62, %v1254_v34  ;;  %v1274_v14 = vmul.f32 %v1396_v49, %v1254_v34 }
 0x3fd   :  { %1289 = vst [vmem:[#allocation5 + $0x60] sm:$0xff] %v1273_v27 }
 0x3fe   :  { %1290 = vst [vmem:[#allocation5 + $0x68] sm:$0xff] %v1274_v14 }
 0x405   :  { %v1239_v30 = vpop.permute.xlu0 %1238 }
 0x406   :  { %v1267_v38 = vmul.f32 %v1397_v32, %v1239_v30  ;;  %v1268_v16 = vmul.f32 %v1398_v40, %v1239_v30 }
 0x408   :  { %1283 = vst [vmem:[#allocation5 + $0x30] sm:$0xff] %v1267_v38 }
 0x409   :  { %1284 = vst [vmem:[#allocation5 + $0x38] sm:$0xff] %v1268_v16 }
 0x40a   :  { %1305 = dma.vmem_to_hbm [thread:$0]  %s1298_s10, 2048, %s1300_s13, [#allocation4], %s1452_s23, %s1452_s23, %s1453_s24  }
 0x40b   :  { %1449 = dma.done.wait [#allocation4], 2048  }
 0x40c   :  { %1450 = vsyncadd [#allocation4], 4294965248 }
 0x40d   :  { %1310 = vsyncpa [#allocation3], 1 }
 0x40e   :  { %1311 = vsyncpa [#allocation4], 1 }

</bundles_post_ra>
